<compile_context>
chip_gen: v6e
topology: v6e:2x2x1
jax: 0.10.0
libtpu: 0.0.40
codegen_flags: <defaults>
</compile_context>

<pallas_src>
import jax
import jax.numpy as jnp
from jax.experimental import pallas as pl
from jax.experimental.pallas import tpu as pltpu

_TARGET_BLOCK_BYTES = 4 * 1024 * 1024   # ~4 MiB per pipelined block (2-D main path)
_RAGGED_BLOCK_BYTES = 256 * 1024        # smaller blocks for the (1, n) ragged path
_VMEM_LIMIT_BYTES = 32 * 1024 * 1024    # explicit: keeps v5e happy with 4 MiB blocks


def _occ_density_kernel(inv_ref, x_ref, o_ref):
    # inv_ref = [1 / (|beta| + beta_min)] in SMEM (f32); single vmul per vreg.
    o_ref[...] = (x_ref[...] * inv_ref[0]).astype(o_ref.dtype)


def _pick_lanes(n):
    # Largest lane-dense width that divides n exactly (no padding / copies needed).
    for lanes in (2048, 1024, 512, 256, 128):
        if n % lanes == 0:
            return lanes
    return None


def _pick_block_rows(rows, lanes, itemsize, sublane):
    """Rows per block: ~4 MiB, sublane-granular, and >= 2 (preferably even) blocks
    whenever there is enough work so both v7x TensorCores get a share."""
    target = max(sublane,
                 (_TARGET_BLOCK_BYTES // (lanes * itemsize)) // sublane * sublane)
    if rows < 2 * sublane:
        return rows                                   # single block (== full dim, legal)
    nblocks = max(2, pl.cdiv(rows, target))           # at least 2 blocks for 2 TCs
    if nblocks % 2:
        nblocks += 1                                  # prefer an even block count
    br = max(sublane, pl.cdiv(pl.cdiv(rows, nblocks), sublane) * sublane)
    return min(br, rows)


def _pick_block_cols(n, itemsize):
    """Lane-block width for the ragged (1, n) path (multiple of 128, >= 2 blocks)."""
    target = max(128, (_RAGGED_BLOCK_BYTES // itemsize) // 128 * 128)
    if n <= 2 * 128:
        return n                                      # one full-width block
    nblocks = max(2, pl.cdiv(n, target))
    if nblocks % 2:
        nblocks += 1
    bc = max(128, pl.cdiv(pl.cdiv(n, nblocks), 128) * 128)
    return min(bc, n)


def occ_density(x, beta, beta_min):
    """Compute x / (|beta| + beta_min) with a Pallas TPU kernel."""
    orig_shape = x.shape
    dtype = x.dtype
    flat = x.reshape(-1)                              # free row-major view
    n = flat.shape[0]
    if n == 0:
        return x                                      # empty input: nothing to do

    itemsize = jnp.dtype(dtype).itemsize
    sublane = {4: 8, 2: 16, 1: 32}.get(itemsize, 8)

    # Hoisted scalar work: one abs/add/reciprocal total, passed via SMEM.
    denom = jnp.abs(jnp.asarray(beta, jnp.float32)) + jnp.asarray(beta_min, jnp.float32)
    inv = (1.0 / denom).reshape(1)

    lanes = _pick_lanes(n)
    if lanes is not None:
        # Common case: lane-dense 2-D slab, rows tiled in ~4 MiB blocks.
        rows = n // lanes
        x2d = flat.reshape(rows, lanes)               # free reshape
        block_rows = _pick_block_rows(rows, lanes, itemsize, sublane)
        block = (block_rows, lanes)
        grid = (pl.cdiv(rows, block_rows),)
        index_map = lambda i: (i, 0)
    else:
        # Ragged case: view as (1, n) (free) and tile along lanes; Pallas masks the
        # partial final block, so no jnp.pad / output-slice HBM passes.
        rows, lanes = 1, n
        x2d = flat.reshape(1, n)
        block_cols = _pick_block_cols(n, itemsize)
        block = (1, block_cols)
        grid = (pl.cdiv(n, block_cols),)
        index_map = lambda i: (0, i)

    out2d = pl.pallas_call(
        _occ_density_kernel,
        out_shape=jax.ShapeDtypeStruct((rows, lanes), dtype),
        grid_spec=pltpu.PrefetchScalarGridSpec(
            num_scalar_prefetch=0,
            grid=grid,
            in_specs=[
                pl.BlockSpec(memory_space=pltpu.MemorySpace.SMEM),   # [inv]
                pl.BlockSpec(block, index_map),                      # x tile
            ],
            out_specs=pl.BlockSpec(block, index_map),
        ),
        compiler_params=pltpu.CompilerParams(
            dimension_semantics=("parallel",),
            vmem_limit_bytes=_VMEM_LIMIT_BYTES,
        ),
        cost_estimate=pl.CostEstimate(
            flops=n, transcendentals=0, bytes_accessed=2 * n * itemsize
        ),
    )(inv, x2d)

    return out2d.reshape(orig_shape)


if __name__ == "__main__":
    key = jax.random.PRNGKey(0)

    # Parameters matching OccDensity.__init__ (beta scalar + beta_min constant).
    beta_init = 0.1     # opts.beta_init
    beta_min = 1e-4     # opts.beta_min
    beta = jnp.float32(beta_init)

    def ref_fn(x):
        return x / (jnp.abs(beta) + beta_min)

    # Small NCHW occupancy input (single-block path).
    x = jax.random.normal(key, (2, 4, 16, 16), dtype=jnp.float32)
    out = jax.block_until_ready(occ_density(x, beta, beta_min))
    assert out.shape == x.shape
    assert jnp.allclose(out, ref_fn(x), rtol=1e-5, atol=1e-6), "mismatch vs reference"

    # Size not divisible by 128 (exercises the zero-copy ragged path).
    x2 = jax.random.normal(jax.random.PRNGKey(1), (3, 5, 7, 11), dtype=jnp.float32)
    out2 = jax.block_until_ready(occ_density(x2, beta, beta_min))
    assert out2.shape == x2.shape
    assert jnp.allclose(out2, ref_fn(x2), rtol=1e-5, atol=1e-6), "mismatch (ragged path)"

    # Slightly larger input (exercises the multi-block / parallel-grid path).
    x3 = jax.random.normal(jax.random.PRNGKey(2), (16, 4, 32, 32), dtype=jnp.float32)
    out3 = jax.block_until_ready(occ_density(x3, beta, beta_min))
    assert out3.shape == x3.shape
    assert jnp.allclose(out3, ref_fn(x3), rtol=1e-5, atol=1e-6), "mismatch (multi-block)"

    print("KERNEL_OK")
</pallas_src>

<mosaic_0001>
module attributes {stable_mosaic.version = 11 : i64} {
  func.func @_occ_density_kernel(%arg0: i32, %arg1: memref<1xf32, #tpu.memory_space<smem>>, %arg2: memref<1x2048xf32, #tpu.memory_space<vmem>>, %arg3: memref<1x2048xf32, #tpu.memory_space<vmem>>) attributes {dimension_semantics = [#tpu.dimension_semantics<parallel>], iteration_bounds = array<i64: 1>, scalar_prefetch = 0 : i64, scratch_operands = 0 : i64, tpu.core_type = #tpu.core_type<tc>, window_params = [{transform_indices = @transform_0, window_bounds = array<i64: 1>}, {transform_indices = @transform_1, window_bounds = array<i64: 1, 2048>}, {transform_indices = @transform_2, window_bounds = array<i64: 1, 2048>}]} {
    %c0 = arith.constant 0 : index
    %c0_0 = arith.constant 0 : index
    %0 = vector.load %arg2[%c0, %c0_0] : memref<1x2048xf32, #tpu.memory_space<vmem>>, vector<1x2048xf32>
    %c0_1 = arith.constant 0 : index
    %1 = memref.load %arg1[%c0_1] : memref<1xf32, #tpu.memory_space<smem>>
    %2 = vector.broadcast %1 : f32 to vector<1x2048xf32>
    %3 = arith.mulf %0, %2 : vector<1x2048xf32>
    %c0_2 = arith.constant 0 : index
    %c0_3 = arith.constant 0 : index
    %4 = vector.load %arg3[%c0_2, %c0_3] : memref<1x2048xf32, #tpu.memory_space<vmem>>, vector<1x2048xf32>
    tpu.vector_store %arg3[%c0_2, %c0_3], %3 {strides = array<i32>} : memref<1x2048xf32, #tpu.memory_space<vmem>>, vector<1x2048xf32>,
    return
  }
  func.func @transform_0(%arg0: i32) -> i32 {
    %c0_i32 = arith.constant 0 : i32
    %c0_i32_0 = arith.constant 0 : i32
    return %c0_i32 : i32
  }
  func.func @transform_1(%arg0: i32) -> (i32, i32) {
    %c0_i32 = arith.constant 0 : i32
    %c0_i32_0 = arith.constant 0 : i32
    return %arg0, %c0_i32 : i32, i32
  }
  func.func @transform_2(%arg0: i32) -> (i32, i32) {
    %c0_i32 = arith.constant 0 : i32
    %c0_i32_0 = arith.constant 0 : i32
    return %arg0, %c0_i32 : i32, i32
  }
}

</mosaic_0001>

<bundles_post_ra>
// kernel: tpu_custom_call.1
= control target key start
LH: loop header
LB: loop body
LE: loop exit
PB: predicated region body
PF: predicated region fallthrough
CT: control target
= control target key end

     0   :  { %8 = vsyncpa [#allocation4], 0  ;;  %s120_s0 = inlined_call_operand.<no memory space> [shape: f32[1], index: 0, kind: input, shape index: {}]   ;;  %s121_s1 = inlined_call_operand.hbm [shape: f32[1,2048], index: 1, kind: input, shape index: {}]   ;;  %s122_s2 = inlined_call_operand.hbm [shape: f32[1,2048], index: 2, kind: output, shape index: {}]  }
   0x1   :  { %9 = vsyncpa [#allocation5], 0  ;;  %s94_s9 = smov [#allocation3]  }
   0x2   :  { %s18_s10 = sshll.u32 %s94_s9, 4  ;;  %s19_s10 = int_to_ptr.vmem [resolvable:$true] %s18_s10 }
   0x3   :  { %s58_s11 = scalar_lea.vmem %s19_s10, 256  ;;  %p63_p1 = scmp.lt.s32.totalorder %s19_s10, %s19_s10 }
   0x4   :  { %p59_p0 = scmp.ne.s32.totalorder %s19_s10, %s58_s11  ;;  %p64_p2 = scmp.lt.s32.totalorder %s58_s11, %s58_s11 }
   0x6   :  { %p65_p3 = por %p64_p2, %p63_p1 }
   0x8   :  { %p66_p4 = pnand %p65_p3, %p59_p0 }
   0xa   :  { %69 = shalt.err (!%p66_p4)
}
   0xb   :  { %21 = dma.hbm_to_vmem [thread:$0]  %s121_s1, 256, %s19_s10, [#allocation4]  }
   0xc   :  { %90 = dma.done.wait [#allocation4], 256  }
   0xd   :  { %91 = vsyncadd [#allocation4], 4294967040  ;;  %v28_v0 = vstv %s120_s0  ;;  %s95_s16 = smov [#allocation6]   ;;  %v25_v1 = vld [vmem:[#allocation3] sm:$0xff]  ;;  %v26_v2 = vld [vmem:[#allocation3 + $0x8] sm:$0xff] }
   0xe   :  { %s39_s17 = sshll.u32 %s95_s16, 4  ;;  %v29_v3 = vmul.f32 %v28_v0, %v25_v1  ;;  %v30_v4 = vmul.f32 %v28_v0, %v26_v2  ;;  %s40_s17 = int_to_ptr.vmem [resolvable:$true] %s39_s17 }
   0xf   :  { %s70_s18 = scalar_lea.vmem %s40_s17, 256  ;;  %p75_p6 = scmp.lt.s32.totalorder %s40_s17, %s40_s17 }
  0x10   :  { %31 = vst [vmem:[#allocation6] sm:$0xff] %v29_v3  ;;  %32 = vst [vmem:[#allocation6 + $0x8] sm:$0xff] %v30_v4  ;;  %p71_p5 = scmp.ne.s32.totalorder %s40_s17, %s70_s18  ;;  %p76_p7 = scmp.lt.s32.totalorder %s70_s18, %s70_s18 }
  0x12   :  { %p77_p8 = por %p76_p7, %p75_p6 }
  0x14   :  { %p78_p9 = pnand %p77_p8, %p71_p5 }
  0x16   :  { %81 = shalt.err (!%p78_p9)
}
  0x17   :  { %42 = dma.vmem_to_hbm [thread:$0]  %s40_s17, 256, %s122_s2, [#allocation5]  }
  0x18   :  { %92 = dma.done.wait [#allocation5], 256  }
  0x19   :  { %93 = vsyncadd [#allocation5], 4294967040 }
  0x1a   :  { %46 = vsyncpa [#allocation4], 1 }
  0x1b   :  { %47 = vsyncpa [#allocation5], 1 }

</bundles_post_ra>
